<compile_context>
chip_gen: v7x
topology: tpu7x:2x2x1
jax: 0.10.0
libtpu: 0.0.40
codegen_flags: <defaults>
</compile_context>

<pallas_src>
import jax
import jax.numpy as jnp
from jax.experimental import pallas as pl
from jax.experimental.pallas import tpu as pltpu

ROW_REPS = 2    # cat([v1, v1], dim=0)
COL_REPS = 24   # cat dim=1: x3 (3) * x4 (4) * final (2)
RHS_REPS = 4    # column replication folded into the MXU RHS (4 * N = 128 lanes for N=32)


def _cat_mm_kernel(x1_ref, x2_ref, o_ref):
    M = x1_ref.shape[0]
    N = x2_ref.shape[1]
    slab = RHS_REPS * N                  # 128 lanes for N=32 -> lane-aligned tile

    # Fold 4x of the column replication into the MXU RHS: one small (K, 4N)
    # replication feeding a single MXU pass that yields a lane-aligned tile.
    x2 = x2_ref[...]
    x2_rep = jnp.concatenate([x2] * RHS_REPS, axis=1)                  # (K, 4N)
    tile = jnp.dot(x1_ref[...], x2_rep, preferred_element_type=jnp.float32)  # (M, 4N) f32

    # Remaining replication = pure vreg-granular copies: 2 row reps x 6 lane
    # slabs = 12 unrolled, statically-indexed, aligned full-vreg stores.
    n_col_slabs = COL_REPS // RHS_REPS   # 6
    for r in range(ROW_REPS):
        for c in range(n_col_slabs):
            o_ref[pl.ds(r * M, M), pl.ds(c * slab, slab)] = tile


def cat_mm(x1: jax.Array, x2: jax.Array) -> jax.Array:
    M, K = x1.shape
    K2, N = x2.shape
    assert K == K2, "inner dims must match"
    assert COL_REPS % RHS_REPS == 0

    out_shape = jax.ShapeDtypeStruct((ROW_REPS * M, COL_REPS * N), jnp.float32)

    # No grid: one invocation, whole arrays resident in VMEM (inputs are
    # 0.5 KiB / 2 KiB, output 48 KiB — far under every generation's VMEM).
    return pl.pallas_call(
        _cat_mm_kernel,
        out_shape=out_shape,
        in_specs=[
            pl.BlockSpec(memory_space=pltpu.MemorySpace.VMEM),
            pl.BlockSpec(memory_space=pltpu.MemorySpace.VMEM),
        ],
        out_specs=pl.BlockSpec(memory_space=pltpu.MemorySpace.VMEM),
    )(x1, x2)


def cat_mm_reference(x1: jax.Array, x2: jax.Array) -> jax.Array:
    v1 = x1 @ x2
    t1 = jnp.concatenate([v1, v1], axis=0)
    t3 = jnp.concatenate([t1, t1, t1], axis=1)
    t4 = jnp.concatenate([t3, t3, t3, t3], axis=1)
    return jnp.concatenate([t4, t4], axis=1)


if __name__ == "__main__":
    key = jax.random.PRNGKey(0)
    k1, k2 = jax.random.split(key)

    M, K, N = 8, 16, 32  # small shapes consistent with the 2-D mm forward
    x1 = jax.random.normal(k1, (M, K), dtype=jnp.float32)
    x2 = jax.random.normal(k2, (K, N), dtype=jnp.float32)

    out = cat_mm(x1, x2)
    out = jax.block_until_ready(out)

    ref = cat_mm_reference(x1, x2)
    assert out.shape == (ROW_REPS * M, COL_REPS * N), out.shape
    assert jnp.allclose(out, ref, atol=1e-5, rtol=1e-5), "mismatch vs reference"

    print("KERNEL_OK")
</pallas_src>

<mosaic_0001>
module attributes {stable_mosaic.version = 11 : i64} {
  func.func @_cat_mm_kernel(%arg0: memref<8x16xf32, #tpu.memory_space<vmem>>, %arg1: memref<16x32xf32, #tpu.memory_space<vmem>>, %arg2: memref<16x768xf32, #tpu.memory_space<vmem>>) attributes {dimension_semantics = [], scalar_prefetch = 0 : i64, scratch_operands = 0 : i64, tpu.core_type = #tpu.core_type<tc>} {
    %c0 = arith.constant 0 : index
    %c0_0 = arith.constant 0 : index
    %0 = vector.load %arg1[%c0, %c0_0] : memref<16x32xf32, #tpu.memory_space<vmem>>, vector<16x32xf32>
    %1 = tpu.concatenate %0, %0, %0, %0 in 1 : vector<16x32xf32>, vector<16x32xf32>, vector<16x32xf32>, vector<16x32xf32> -> vector<16x128xf32>
    %c0_1 = arith.constant 0 : index
    %c0_2 = arith.constant 0 : index
    %2 = vector.load %arg0[%c0_1, %c0_2] : memref<8x16xf32, #tpu.memory_space<vmem>>, vector<8x16xf32>
    %cst = arith.constant dense<0.000000e+00> : vector<8x128xf32>
    %3 = tpu.matmul %2, %1, %cst {dimension_numbers = #tpu.dot_dimension_numbers<[1], [0], [0], [1], [0, 0, 1, 1], [], []>} : vector<8x16xf32>, vector<16x128xf32>, vector<8x128xf32> -> vector<8x128xf32>
    %c0_3 = arith.constant 0 : index
    %c0_4 = arith.constant 0 : index
    %4 = vector.load %arg2[%c0_3, %c0_4] : memref<16x768xf32, #tpu.memory_space<vmem>>, vector<8x128xf32>
    tpu.vector_store %arg2[%c0_3, %c0_4], %3 {strides = array<i32>} : memref<16x768xf32, #tpu.memory_space<vmem>>, vector<8x128xf32>,
    %c0_5 = arith.constant 0 : index
    %c128 = arith.constant 128 : index
    %5 = vector.load %arg2[%c0_5, %c128] : memref<16x768xf32, #tpu.memory_space<vmem>>, vector<8x128xf32>
    tpu.vector_store %arg2[%c0_5, %c128], %3 {strides = array<i32>} : memref<16x768xf32, #tpu.memory_space<vmem>>, vector<8x128xf32>,
    %c0_6 = arith.constant 0 : index
    %c256 = arith.constant 256 : index
    %6 = vector.load %arg2[%c0_6, %c256] : memref<16x768xf32, #tpu.memory_space<vmem>>, vector<8x128xf32>
    tpu.vector_store %arg2[%c0_6, %c256], %3 {strides = array<i32>} : memref<16x768xf32, #tpu.memory_space<vmem>>, vector<8x128xf32>,
    %c0_7 = arith.constant 0 : index
    %c384 = arith.constant 384 : index
    %7 = vector.load %arg2[%c0_7, %c384] : memref<16x768xf32, #tpu.memory_space<vmem>>, vector<8x128xf32>
    tpu.vector_store %arg2[%c0_7, %c384], %3 {strides = array<i32>} : memref<16x768xf32, #tpu.memory_space<vmem>>, vector<8x128xf32>,
    %c0_8 = arith.constant 0 : index
    %c512 = arith.constant 512 : index
    %8 = vector.load %arg2[%c0_8, %c512] : memref<16x768xf32, #tpu.memory_space<vmem>>, vector<8x128xf32>
    tpu.vector_store %arg2[%c0_8, %c512], %3 {strides = array<i32>} : memref<16x768xf32, #tpu.memory_space<vmem>>, vector<8x128xf32>,
    %c0_9 = arith.constant 0 : index
    %c640 = arith.constant 640 : index
    %9 = vector.load %arg2[%c0_9, %c640] : memref<16x768xf32, #tpu.memory_space<vmem>>, vector<8x128xf32>
    tpu.vector_store %arg2[%c0_9, %c640], %3 {strides = array<i32>} : memref<16x768xf32, #tpu.memory_space<vmem>>, vector<8x128xf32>,
    %c8 = arith.constant 8 : index
    %c0_10 = arith.constant 0 : index
    %10 = vector.load %arg2[%c8, %c0_10] : memref<16x768xf32, #tpu.memory_space<vmem>>, vector<8x128xf32>
    tpu.vector_store %arg2[%c8, %c0_10], %3 {strides = array<i32>} : memref<16x768xf32, #tpu.memory_space<vmem>>, vector<8x128xf32>,
    %c8_11 = arith.constant 8 : index
    %c128_12 = arith.constant 128 : index
    %11 = vector.load %arg2[%c8_11, %c128_12] : memref<16x768xf32, #tpu.memory_space<vmem>>, vector<8x128xf32>
    tpu.vector_store %arg2[%c8_11, %c128_12], %3 {strides = array<i32>} : memref<16x768xf32, #tpu.memory_space<vmem>>, vector<8x128xf32>,
    %c8_13 = arith.constant 8 : index
    %c256_14 = arith.constant 256 : index
    %12 = vector.load %arg2[%c8_13, %c256_14] : memref<16x768xf32, #tpu.memory_space<vmem>>, vector<8x128xf32>
    tpu.vector_store %arg2[%c8_13, %c256_14], %3 {strides = array<i32>} : memref<16x768xf32, #tpu.memory_space<vmem>>, vector<8x128xf32>,
    %c8_15 = arith.constant 8 : index
    %c384_16 = arith.constant 384 : index
    %13 = vector.load %arg2[%c8_15, %c384_16] : memref<16x768xf32, #tpu.memory_space<vmem>>, vector<8x128xf32>
    tpu.vector_store %arg2[%c8_15, %c384_16], %3 {strides = array<i32>} : memref<16x768xf32, #tpu.memory_space<vmem>>, vector<8x128xf32>,
    %c8_17 = arith.constant 8 : index
    %c512_18 = arith.constant 512 : index
    %14 = vector.load %arg2[%c8_17, %c512_18] : memref<16x768xf32, #tpu.memory_space<vmem>>, vector<8x128xf32>
    tpu.vector_store %arg2[%c8_17, %c512_18], %3 {strides = array<i32>} : memref<16x768xf32, #tpu.memory_space<vmem>>, vector<8x128xf32>,
    %c8_19 = arith.constant 8 : index
    %c640_20 = arith.constant 640 : index
    %15 = vector.load %arg2[%c8_19, %c640_20] : memref<16x768xf32, #tpu.memory_space<vmem>>, vector<8x128xf32>
    tpu.vector_store %arg2[%c8_19, %c640_20], %3 {strides = array<i32>} : memref<16x768xf32, #tpu.memory_space<vmem>>, vector<8x128xf32>,
    return
  }
}

</mosaic_0001>

<bundles_post_ra>
// kernel: tpu_custom_call.1
= control target key start
LH: loop header
LB: loop body
LE: loop exit
PB: predicated region body
PF: predicated region fallthrough
CT: control target
= control target key end

     0   :  { %7 = vsyncpa [#allocation3], 0  ;;  %s366_s0 = inlined_call_operand.hbm [shape: f32[8,16], index: 0, kind: input, shape index: {}]   ;;  %s367_s1 = inlined_call_operand.hbm [shape: f32[16,32], index: 1, kind: input, shape index: {}]   ;;  %s368_s2 = inlined_call_operand.hbm [shape: f32[16,768], index: 2, kind: output, shape index: {}]  }
   0x1   :  { %8 = vsyncpa [#allocation6], 0 }
   0x2   :  { %9 = vsyncpa [#allocation4], 0  ;;  %s288_s9 = smov [#allocation2]   ;;  %s289_s11 = smov [#allocation5]  }
   0x3   :  { %s16_s10 = sshll.u32 %s288_s9, 4  ;;  %s25_s12 = sshll.u32 %s289_s11, 4  ;;  %s17_s10 = int_to_ptr.vmem [resolvable:$true] %s16_s10  ;;  %s316_s12 = int_to_ptr.vmem [resolvable:$true] %s25_s12 }
   0x4   :  { %s216_s15 = scalar_lea.hbm %s366_s0, 128 }
   0x5   :  { %p217_p0 = scmp.ne.s32.totalorder %s366_s0, %s216_s15  ;;  %p220_p1 = scmp.lt.u32.totalorder %s216_s15, %s366_s0 }
   0x7   :  { %p222_p2 = pnand %p220_p1, %p217_p0 }
   0x9   :  { %225 = shalt.err (!%p222_p2)
}
   0xa   :  { %s226_s20 = scalar_lea.vmem %s17_s10, 128  ;;  %p231_p4 = scmp.lt.s32.totalorder %s17_s10, %s17_s10 }
   0xb   :  { %p227_p3 = scmp.ne.s32.totalorder %s17_s10, %s226_s20  ;;  %p232_p5 = scmp.lt.s32.totalorder %s226_s20, %s226_s20 }
   0xd   :  { %p233_p6 = por %p232_p5, %p231_p4 }
   0xf   :  { %p234_p7 = pnand %p233_p6, %p227_p3 }
  0x11   :  { %237 = shalt.err (!%p234_p7)
}
  0x12   :  { %19 = dma.hbm_to_vmem [thread:$0]  %s366_s0, 128, %s17_s10, [#allocation3]  }
  0x13   :  { %s238_s25 = scalar_lea.hbm %s367_s1, 256 }
  0x14   :  { %p239_p8 = scmp.ne.s32.totalorder %s367_s1, %s238_s25  ;;  %p242_p9 = scmp.lt.u32.totalorder %s238_s25, %s367_s1 }
  0x16   :  { %p244_p10 = pnand %p242_p9, %p239_p8 }
  0x18   :  { %247 = shalt.err (!%p244_p10)
}
  0x19   :  { %s248_s30 = scalar_lea.vmem %s316_s12, 256  ;;  %p253_p12 = scmp.lt.s32.totalorder %s316_s12, %s316_s12 }
  0x1a   :  { %p249_p11 = scmp.ne.s32.totalorder %s316_s12, %s248_s30  ;;  %p254_p13 = scmp.lt.s32.totalorder %s248_s30, %s248_s30 }
  0x1c   :  { %p255_p0 = por %p254_p13, %p253_p12 }
  0x1e   :  { %p256_p1 = pnand %p255_p0, %p249_p11 }
  0x20   :  { %259 = shalt.err (!%p256_p1)
}
  0x21   :  { %s290_s0 = smov 128   ;;  %s291_s3 = smov 8  }
  0x22   :  { %31 = dma.hbm_to_vmem [thread:$0]  %s367_s1, 256, %s316_s12, [#allocation6], %s290_s0, %s290_s0, %s291_s3  }
  0x23   :  { %282 = dma.done.wait [#allocation3], 128  }
  0x24   :  { %283 = vsyncadd [#allocation3], 4294967168 }
  0x25   :  { %284 = dma.done.wait [#allocation6], 256  }
  0x26   :  { %285 = vsyncadd [#allocation6], 4294967040  ;;  %v292_v0 = vmov 0.0|0.0   ;;  %v38_v1 = vld [vmem:[#allocation5] sm:$0xff]  ;;  %v39_v2 = vld [vmem:[#allocation5 + $0x8] sm:$0xff]  ;;  %vm293_vm0 = vmmov 0  }
  0x27   :  { %185 = vmatprep.subr.bf16.mxu0 %v292_v0  ;;  %v201_v3 = vpack.i.bf16 %v39_v2, %v38_v1  ;;  %v294_v4 = vmov 0.0   ;;  %s295_s6 = smov 32   ;;  %s296_s7 = smov 96   ;;  %vm60_vm1 = vcmask 261120   ;;  %vm63_vm2 = vcmask 523264   ;;  %v69_v21 = vld [vmem:[#allocation2] sm:$0xff] }
  0x28   :  { %182 = vmatprep.mubr.msk.f32.mxu0 %vm293_vm0, %v294_v4  ;;  %s297_s8 = smov 64   ;;  %vm66_vm3 = vcmask 785408   ;;  %vm70_vm4 = vcmask 130048   ;;  %s298_s1 = smov [#allocation7]  }
  0x29   :  { %202 = vrot.lane.b32.xlu0 %v201_v3, %s295_s6  ;;  %212 = vrot.lane.b32.xlu1 %v201_v3, %s296_s7  ;;  %s161_s9 = sshll.u32 %s298_s1, 4  ;;  %s347_s9 = int_to_ptr.vmem [resolvable:$true] %s161_s9 }
  0x2a   :  { %s260_s10 = scalar_lea.vmem %s347_s9, 1536  ;;  %p265_p3 = scmp.lt.s32.totalorder %s347_s9, %s347_s9 }
  0x2b   :  { %p261_p2 = scmp.ne.s32.totalorder %s347_s9, %s260_s10  ;;  %p266_p4 = scmp.lt.s32.totalorder %s260_s10, %s260_s10 }
  0x2d   :  { %207 = vrot.lane.b32.xlu0 %v201_v3, %s297_s8  ;;  %p267_p5 = por %p266_p4, %p265_p3 }
  0x2f   :  { %p268_p6 = pnand %p267_p5, %p261_p2 }
  0x9b   :  { %v203_v5 = vpop.permute.xlu0 %202  ;;  %v213_v6 = vpop.permute.xlu1 %212 }
  0x9c   :  { %v205_v7 = vunpack.i.h.bf16 %v203_v5  ;;  %v204_v8 = vunpack.i.l.bf16 %v203_v5  ;;  %v215_v10 = vunpack.i.h.bf16 %v213_v6  ;;  %v214_v11 = vunpack.i.l.bf16 %v213_v6 }
  0x9e   :  { %v62_v14 = vsel %vm60_vm1, %v39_v2, %v205_v7  ;;  %v61_v15 = vsel %vm60_vm1, %v38_v1, %v204_v8 }
  0x9f   :  { %v208_v9 = vpop.permute.xlu0 %207 }
  0xa0   :  { %v210_v12 = vunpack.i.h.bf16 %v208_v9  ;;  %v209_v13 = vunpack.i.l.bf16 %v208_v9 }
  0xa2   :  { %v64_v16 = vsel %vm63_vm2, %v61_v15, %v209_v13  ;;  %v65_v17 = vsel %vm63_vm2, %v62_v14, %v210_v12 }
  0xa3   :  { %v67_v18 = vsel %vm66_vm3, %v64_v16, %v214_v11  ;;  %v68_v19 = vsel %vm66_vm3, %v65_v17, %v215_v10 }
  0xa4   :  { %v186_v20 = vpack.c.bf16 %v68_v19, %v67_v18 }
  0xa6   :  { %187 = vmatpush3.bf16.msra.mxu0 %v186_v20 }
  0xa9   :  { %183 = vmatmul.mubr.msk.f32.vlgmr.msra.gmra.mrb[0].mxu0 %vm70_vm4, %v69_v21 }
 0x17c   :  { %v140_v22 = vpop.f32.mrb[0].mxu0 }
 0x17d   :  { %144 = vst [vmem:[#allocation7] sm:$0xff] %v140_v22  ;;  %145 = vst [vmem:[#allocation7 + $0x8] sm:$0xff] %v140_v22  ;;  %v184_v23 = vpop.f32.mrb[1].mxu0 }
 0x17e   :  { %146 = vst [vmem:[#allocation7 + $0x10] sm:$0xff] %v140_v22  ;;  %147 = vst [vmem:[#allocation7 + $0x18] sm:$0xff] %v140_v22 }
 0x17f   :  { %148 = vst [vmem:[#allocation7 + $0x20] sm:$0xff] %v140_v22  ;;  %149 = vst [vmem:[#allocation7 + $0x28] sm:$0xff] %v140_v22 }
 0x180   :  { %150 = vst [vmem:[#allocation7 + $0x30] sm:$0xff] %v140_v22  ;;  %151 = vst [vmem:[#allocation7 + $0x38] sm:$0xff] %v140_v22 }
 0x181   :  { %152 = vst [vmem:[#allocation7 + $0x40] sm:$0xff] %v140_v22  ;;  %153 = vst [vmem:[#allocation7 + $0x48] sm:$0xff] %v140_v22 }
 0x182   :  { %154 = vst [vmem:[#allocation7 + $0x50] sm:$0xff] %v140_v22  ;;  %155 = vst [vmem:[#allocation7 + $0x58] sm:$0xff] %v140_v22 }
 0x183   :  { %271 = shalt.err (!%p268_p6)
}
 0x184   :  { %s272_s13 = scalar_lea.hbm %s368_s2, 1536 }
 0x185   :  { %p273_p7 = scmp.ne.s32.totalorder %s368_s2, %s272_s13  ;;  %p276_p8 = scmp.lt.u32.totalorder %s272_s13, %s368_s2 }
 0x187   :  { %p278_p9 = pnand %p276_p8, %p273_p7 }
 0x189   :  { %281 = shalt.err (!%p278_p9)
}
 0x18a   :  { %s299_s18 = smov 768   ;;  %s300_s19 = smov 48  }
 0x18b   :  { %167 = dma.vmem_to_hbm [thread:$0]  %s347_s9, 1536, %s368_s2, [#allocation4], %s299_s18, %s299_s18, %s300_s19  }
 0x18c   :  { %286 = dma.done.wait [#allocation4], 1536  }
 0x18d   :  { %287 = vsyncadd [#allocation4], 4294965760 }
 0x18e   :  { %171 = vsyncpa [#allocation3], 1 }
 0x18f   :  { %172 = vsyncpa [#allocation6], 1 }
 0x190   :  { %173 = vsyncpa [#allocation4], 1 }

</bundles_post_ra>
